<compile_context>
chip_gen: v6e
topology: v6e:2x2x1
jax: 0.10.0
libtpu: 0.0.40
codegen_flags: <defaults>
</compile_context>

<pallas_src>
import functools
import math

import jax
import jax.numpy as jnp
from jax import lax
from jax.experimental import pallas as pl
from jax.experimental.pallas import tpu as pltpu

NUM_HEADS = 4


def _erf_approx(x):
  # Abramowitz & Stegun 7.1.26 rational approximation, |err| <= 1.5e-7 (f32).
  p = 0.3275911
  a1, a2, a3, a4, a5 = (0.254829592, -0.284496736, 1.421413741,
                        -1.453152027, 1.061405429)
  ax = jnp.abs(x)
  t = 1.0 / (1.0 + p * ax)
  poly = t * (a1 + t * (a2 + t * (a3 + t * (a4 + t * a5))))
  y = 1.0 - poly * jnp.exp(-ax * ax)
  return jnp.where(x >= 0, y, -y)


def _gelu_exact(x):
  # nn.GELU() default (approximate='none'): 0.5*x*(1+erf(x/sqrt(2)))
  return 0.5 * x * (1.0 + _erf_approx(x * (1.0 / math.sqrt(2.0))))


# ----------------------------- Stage 1 kernel --------------------------------
# Conv3d realised as im2col GEMM + packed qkv projection [R1][R4].
# Output is a lane-dense (TN, 4C = 128) bf16 slab: [x_embed | q | k | v].
def _embed_qkv_kernel(patches_ref, wc_ref, wqkv_ref, packed_ref):
  f32 = jnp.float32
  patches = patches_ref[0]                                          # (TN, K) bf16
  x_embed = jnp.dot(patches, wc_ref[...], preferred_element_type=f32)  # (TN, C)
  qkv = jnp.dot(x_embed.astype(jnp.bfloat16), wqkv_ref[...],
                preferred_element_type=f32)                         # (TN, 3C)
  # Single full-width lane-dense store (no masked partial stores) [R2][R3].
  packed_ref[0] = jnp.concatenate([x_embed, qkv], axis=-1).astype(packed_ref.dtype)


# ----------------------------- Stage 2 kernel --------------------------------
# Flash-style online-softmax attention over kv tiles [R5], fused with the
# projection, residuals and GELU MLP on the last kv step; emits the transposed
# (C, TQ) block so the HBM layout is lane-dense (B, C, N) [R3].
def _flash_attn_mlp_kernel(q_pack_ref, kv_pack_ref, wproj_ref, bproj_ref,
                           wfc1_ref, bfc1_ref, wfc2_ref, bfc2_ref,
                           out_ref, m_scr, l_scr, acc_scr,
                           *, scale, num_heads, emb):
  f32 = jnp.float32
  bf16 = jnp.bfloat16
  hd = emb // num_heads
  ki = pl.program_id(2)

  @pl.when(ki == 0)
  def _():
    m_scr[...] = jnp.full(m_scr.shape, -jnp.inf, f32)
    l_scr[...] = jnp.zeros(l_scr.shape, f32)
    acc_scr[...] = jnp.zeros(acc_scr.shape, f32)

  q_pack = q_pack_ref[0]            # (TQ, 4C) bf16 : [x_embed | q | k | v]
  kv_pack = kv_pack_ref[0]          # (TK, 4C) bf16
  m_prev = m_scr[...]               # (TQ, H)
  l_prev = l_scr[...]               # (TQ, H)
  acc_prev = acc_scr[...]           # (TQ, C)

  # Per-head online softmax; head split is a one-time in-register lane slice
  # of the packed slab [R9]; results are concatenated and written full-width
  # (no lane-masked column stores) [R2].
  m_parts, l_parts, acc_parts = [], [], []
  for h in range(num_heads):
    hsl = slice(h * hd, (h + 1) * hd)
    q_h = q_pack[:, emb + h * hd: emb + (h + 1) * hd]               # (TQ, hd)
    k_h = kv_pack[:, 2 * emb + h * hd: 2 * emb + (h + 1) * hd]      # (TK, hd)
    v_h = kv_pack[:, 3 * emb + h * hd: 3 * emb + (h + 1) * hd]      # (TK, hd)
    s = lax.dot_general(q_h, k_h, (((1,), (1,)), ((), ())),
                        preferred_element_type=f32) * scale         # (TQ, TK)
    m_h_prev = m_prev[:, h:h + 1]
    m_h = jnp.maximum(m_h_prev, jnp.max(s, axis=-1, keepdims=True))
    alpha = jnp.exp(m_h_prev - m_h)
    p = jnp.exp(s - m_h)
    l_h = alpha * l_prev[:, h:h + 1] + jnp.sum(p, axis=-1, keepdims=True)
    acc_h = alpha * acc_prev[:, hsl] + jnp.dot(
        p.astype(bf16), v_h, preferred_element_type=f32)            # (TQ, hd)
    m_parts.append(m_h)
    l_parts.append(l_h)
    acc_parts.append(acc_h)

  m_scr[...] = jnp.concatenate(m_parts, axis=-1)
  l_scr[...] = jnp.concatenate(l_parts, axis=-1)
  acc_scr[...] = jnp.concatenate(acc_parts, axis=-1)

  @pl.when(ki == pl.num_programs(2) - 1)
  def _():
    x_embed = q_pack[:, :emb].astype(f32)                           # (TQ, C)
    inv_l = pl.reciprocal(l_scr[...], approx=True)                  # [R8]
    attn = jnp.concatenate(
        [acc_scr[:, h * hd:(h + 1) * hd] * inv_l[:, h:h + 1]
         for h in range(num_heads)], axis=-1)                       # (TQ, C)
    x_attn = jnp.dot(attn.astype(bf16), wproj_ref[...],
                     preferred_element_type=f32) + bproj_ref[...]
    x1 = x_embed + x_attn                                           # residual 1
    h1 = jnp.dot(x1.astype(bf16), wfc1_ref[...],
                 preferred_element_type=f32) + bfc1_ref[...]
    h1 = _gelu_exact(h1)
    mlp = jnp.dot(h1.astype(bf16), wfc2_ref[...],
                  preferred_element_type=f32) + bfc2_ref[...]
    # Transposed, lane-dense (C, TQ) store [R3]; residual 2.
    out_ref[0] = (x1 + mlp).T.astype(out_ref.dtype)


# ------------------------------- Wrapper --------------------------------------
def _im2col_3d(x, kernel, stride, pad):
  """NCDHW -> (B, N, Cin*k^3) patches, flattening order (Cin, kz, ky, kx)."""
  # TODO(synk): replace wrapper-side im2col (8x HBM inflation for k=4,s=2) with
  # in-kernel shifted-GEMM accumulation over the taps.
  B, C, Z, Y, X = x.shape
  xp = jnp.pad(x, ((0, 0), (0, 0), (pad, pad), (pad, pad), (pad, pad)))
  Zo = (Z + 2 * pad - kernel) // stride + 1
  Yo = (Y + 2 * pad - kernel) // stride + 1
  Xo = (X + 2 * pad - kernel) // stride + 1
  cols = []
  for kz in range(kernel):
    for ky in range(kernel):
      for kx in range(kernel):
        cols.append(xp[:, :,
                       kz:kz + stride * Zo:stride,
                       ky:ky + stride * Yo:stride,
                       kx:kx + stride * Xo:stride])
  cols = jnp.stack(cols, axis=2)                  # (B, C, k^3, Zo, Yo, Xo)
  cols = cols.transpose(0, 3, 4, 5, 1, 2)         # (B, Zo, Yo, Xo, C, k^3)
  return cols.reshape(B, Zo * Yo * Xo, C * kernel ** 3), (Zo, Yo, Xo)


def encoder_layer_pallas(x, params, *, nf_in, nf_out, layer):
  conv_k = 4 if layer < 2 else 1
  conv_s = 2 if layer < 2 else 1
  conv_p = 1 if layer < 2 else 0
  num_heads = NUM_HEADS
  # Matches the reviewed module: head_dim for scaling derives from nf_in.
  scale = float((nf_in // num_heads) ** -0.5)
  C = nf_out
  assert C % num_heads == 0

  f32 = jnp.float32
  bf16 = jnp.bfloat16

  patches, (Zo, Yo, Xo) = _im2col_3d(x.astype(f32), conv_k, conv_s, conv_p)
  patches = patches.astype(bf16)                      # [R4]
  B, N, K = patches.shape

  # [R5]/[R6] token tile: 128 when it divides N (lane-dense, (8,128)-aligned);
  # for tiny test volumes fall back to the full (small) N.
  TN = 128 if N % 128 == 0 else N
  assert N % TN == 0 and TN % 8 == 0

  # [R1] packed qkv projection weight; [R4] bf16 GEMM weights.
  wc = params["w_conv"].transpose(1, 2, 3, 4, 0).reshape(K, C).astype(bf16)
  wqkv = jnp.concatenate([params["wq"], params["wkv"]], axis=1).astype(bf16)

  # [R6] explicit VMEM budget, well under v7x's 64 MiB physical VMEM
  # (double-buffered working set per step is only a few hundred KiB).
  vmem_limit = 32 * 1024 * 1024

  # ---- Stage 1: conv patch-embed + packed qkv projection --------------------
  packed = pl.pallas_call(
      _embed_qkv_kernel,
      out_shape=jax.ShapeDtypeStruct((B, N, 4 * C), bf16),
      grid_spec=pltpu.PrefetchScalarGridSpec(
          num_scalar_prefetch=0,
          grid=(B, N // TN),
          in_specs=[
              pl.BlockSpec((1, TN, K), lambda b, n: (b, n, 0)),
              pl.BlockSpec((K, C), lambda b, n: (0, 0)),
              pl.BlockSpec((C, 3 * C), lambda b, n: (0, 0)),
          ],
          out_specs=pl.BlockSpec((1, TN, 4 * C), lambda b, n: (b, n, 0)),
      ),
      compiler_params=pltpu.CompilerParams(
          dimension_semantics=("parallel", "parallel"),      # [R7]
          vmem_limit_bytes=vmem_limit),
  )(patches, wc, wqkv)

  # ---- Stage 2: flash attention + proj + MLP + residuals, (B, C, N) out -----
  nqt = N // TN
  nkt = N // TN
  out = pl.pallas_call(
      functools.partial(_flash_attn_mlp_kernel, scale=scale,
                        num_heads=num_heads, emb=C),
      out_shape=jax.ShapeDtypeStruct((B, C, N), f32),        # [R3]
      grid_spec=pltpu.PrefetchScalarGridSpec(
          num_scalar_prefetch=0,
          grid=(B, nqt, nkt),
          in_specs=[
              pl.BlockSpec((1, TN, 4 * C), lambda b, qi, ki: (b, qi, 0)),
              pl.BlockSpec((1, TN, 4 * C), lambda b, qi, ki: (b, ki, 0)),
              pl.BlockSpec((C, C), lambda b, qi, ki: (0, 0)),   # wproj
              pl.BlockSpec((1, C), lambda b, qi, ki: (0, 0)),   # bproj
              pl.BlockSpec((C, C), lambda b, qi, ki: (0, 0)),   # wfc1
              pl.BlockSpec((1, C), lambda b, qi, ki: (0, 0)),   # bfc1
              pl.BlockSpec((C, C), lambda b, qi, ki: (0, 0)),   # wfc2
              pl.BlockSpec((1, C), lambda b, qi, ki: (0, 0)),   # bfc2
          ],
          out_specs=pl.BlockSpec((1, C, TN), lambda b, qi, ki: (b, 0, qi)),
          scratch_shapes=[
              pltpu.VMEM((TN, num_heads), f32),   # running row max (per head)
              pltpu.VMEM((TN, num_heads), f32),   # running denom   (per head)
              pltpu.VMEM((TN, C), f32),           # running weighted V
          ],
      ),
      compiler_params=pltpu.CompilerParams(
          dimension_semantics=("parallel", "parallel", "arbitrary"),  # [R7]
          vmem_limit_bytes=vmem_limit),
  )(packed, packed,
    params["wproj"].astype(bf16), params["bproj"][None, :].astype(f32),
    params["wfc1"].astype(bf16), params["bfc1"][None, :].astype(f32),
    params["wfc2"].astype(bf16), params["bfc2"][None, :].astype(f32))

  # [R3] kernel already emitted (B, C, N): reshape only, no HBM transpose pass.
  return out.reshape(B, C, Zo, Yo, Xo)


# ------------------------------- Reference ------------------------------------
def encoder_layer_ref(x, params, *, nf_in, nf_out, layer):
  """Pure-JAX f32 reference mirroring the forward (for self-check)."""
  conv_k = 4 if layer < 2 else 1
  conv_s = 2 if layer < 2 else 1
  conv_p = 1 if layer < 2 else 0
  num_heads = NUM_HEADS
  scale = float((nf_in // num_heads) ** -0.5)
  C = nf_out

  xe = lax.conv_general_dilated(
      x, params["w_conv"], (conv_s,) * 3, [(conv_p, conv_p)] * 3,
      dimension_numbers=("NCDHW", "OIDHW", "NCDHW"))
  B, _, Zo, Yo, Xo = xe.shape
  xe = xe.transpose(0, 2, 3, 4, 1).reshape(B, Zo * Yo * Xo, C)
  N = xe.shape[1]
  hd = C // num_heads

  q = xe @ params["wq"]
  kv = xe @ params["wkv"]
  k, v = kv[..., :C], kv[..., C:]
  split = lambda t: t.reshape(B, N, num_heads, hd).transpose(0, 2, 1, 3)
  qh, kh, vh = split(q), split(k), split(v)
  attn = jnp.einsum("bhnd,bhmd->bhnm", qh, kh) * scale
  attn = jax.nn.softmax(attn, axis=-1)
  o = jnp.einsum("bhnm,bhmd->bhnd", attn, vh)
  o = o.transpose(0, 2, 1, 3).reshape(B, N, C)
  x_attn = o @ params["wproj"] + params["bproj"]
  x1 = xe + x_attn
  h1 = jax.nn.gelu(x1 @ params["wfc1"] + params["bfc1"], approximate=False)
  mlp = h1 @ params["wfc2"] + params["bfc2"]
  out = x1 + mlp
  return out.transpose(0, 2, 1).reshape(B, C, Zo, Yo, Xo)


if __name__ == "__main__":
  nf_in, nf_out, layer = 4, 32, 0          # layer < 2 -> conv k=4, s=2, p=1
  B, Z, Y, X = 2, 16, 16, 16               # N = (Z/2)*(Y/2)*(X/2) = 512
  C = nf_out

  key = jax.random.PRNGKey(0)
  kx, kc, kq, kkv, kp, kbp, k1, kb1, k2, kb2 = jax.random.split(key, 10)

  x = jax.random.normal(kx, (B, nf_in, Z, Y, X), jnp.float32)
  params = {
      "w_conv": jax.random.normal(kc, (C, nf_in, 4, 4, 4), jnp.float32)
                / math.sqrt(nf_in * 64),
      "wq":    jax.random.normal(kq,  (C, C),     jnp.float32) / math.sqrt(C),
      "wkv":   jax.random.normal(kkv, (C, 2 * C), jnp.float32) / math.sqrt(C),
      "wproj": jax.random.normal(kp,  (C, C),     jnp.float32) / math.sqrt(C),
      "bproj": jax.random.normal(kbp, (C,),       jnp.float32) * 0.02,
      "wfc1":  jax.random.normal(k1,  (C, C),     jnp.float32) / math.sqrt(C),
      "bfc1":  jax.random.normal(kb1, (C,),       jnp.float32) * 0.02,
      "wfc2":  jax.random.normal(k2,  (C, C),     jnp.float32) / math.sqrt(C),
      "bfc2":  jax.random.normal(kb2, (C,),       jnp.float32) * 0.02,
  }

  out = encoder_layer_pallas(x, params, nf_in=nf_in, nf_out=nf_out, layer=layer)
  out = jax.block_until_ready(out)
  assert out.shape == (B, nf_out, Z // 2, Y // 2, X // 2), out.shape

  with jax.default_matmul_precision("highest"):
    ref = encoder_layer_ref(x, params, nf_in=nf_in, nf_out=nf_out, layer=layer)
  ref = jax.block_until_ready(ref)
  max_err = float(jnp.max(jnp.abs(out - ref)))
  # Tolerance loosened vs. the f32 version because all GEMMs now take bf16
  # operands (review item [R4]); accumulation stays f32.
  assert jnp.allclose(out, ref, rtol=1e-1, atol=1e-1), max_err

  print("KERNEL_OK")
</pallas_src>

<mosaic_0001>
module attributes {stable_mosaic.version = 11 : i64} {
  func.func @_embed_qkv_kernel(%arg0: i32, %arg1: i32, %arg2: memref<1x128x256xbf16, #tpu.memory_space<vmem>>, %arg3: memref<256x32xbf16, #tpu.memory_space<vmem>>, %arg4: memref<32x96xbf16, #tpu.memory_space<vmem>>, %arg5: memref<1x128x128xbf16, #tpu.memory_space<vmem>>) attributes {dimension_semantics = [#tpu.dimension_semantics<parallel>, #tpu.dimension_semantics<parallel>], iteration_bounds = array<i64: 2, 4>, scalar_prefetch = 0 : i64, scratch_operands = 0 : i64, tpu.core_type = #tpu.core_type<tc>, window_params = [{transform_indices = @transform_0, window_bounds = array<i64: 1, 128, 256>}, {pipeline_mode = #tpu.pipeline_mode<synchronous>, transform_indices = @transform_1, window_bounds = array<i64: 256, 32>}, {pipeline_mode = #tpu.pipeline_mode<synchronous>, transform_indices = @transform_2, window_bounds = array<i64: 32, 96>}, {transform_indices = @transform_3, window_bounds = array<i64: 1, 128, 128>}]} {
    %c0 = arith.constant 0 : index
    %c0_0 = arith.constant 0 : index
    %c0_1 = arith.constant 0 : index
    %0 = vector.load %arg2[%c0, %c0_0, %c0_1] : memref<1x128x256xbf16, #tpu.memory_space<vmem>>, vector<1x128x256xbf16>
    %1 = vector.shape_cast %0 : vector<1x128x256xbf16> to vector<128x256xbf16>
    %c0_2 = arith.constant 0 : index
    %c0_3 = arith.constant 0 : index
    %2 = vector.load %arg3[%c0_2, %c0_3] : memref<256x32xbf16, #tpu.memory_space<vmem>>, vector<256x32xbf16>
    %cst = arith.constant dense<0.000000e+00> : vector<128x32xf32>
    %3 = tpu.matmul %1, %2, %cst {dimension_numbers = #tpu.dot_dimension_numbers<[1], [0], [0], [1], [0, 0, 1, 1], [], []>} : vector<128x256xbf16>, vector<256x32xbf16>, vector<128x32xf32> -> vector<128x32xf32>
    %4 = arith.truncf %3 : vector<128x32xf32> to vector<128x32xbf16>
    %c0_4 = arith.constant 0 : index
    %c0_5 = arith.constant 0 : index
    %5 = vector.load %arg4[%c0_4, %c0_5] : memref<32x96xbf16, #tpu.memory_space<vmem>>, vector<32x96xbf16>
    %cst_6 = arith.constant dense<0.000000e+00> : vector<128x96xf32>
    %6 = tpu.matmul %4, %5, %cst_6 {dimension_numbers = #tpu.dot_dimension_numbers<[1], [0], [0], [1], [0, 0, 1, 1], [], []>} : vector<128x32xbf16>, vector<32x96xbf16>, vector<128x96xf32> -> vector<128x96xf32>
    %7 = tpu.concatenate %3, %6 in 1 : vector<128x32xf32>, vector<128x96xf32> -> vector<128x128xf32>
    %8 = arith.truncf %7 : vector<128x128xf32> to vector<128x128xbf16>
    %c0_7 = arith.constant 0 : index
    %c0_8 = arith.constant 0 : index
    %c0_9 = arith.constant 0 : index
    %9 = vector.load %arg5[%c0_7, %c0_8, %c0_9] : memref<1x128x128xbf16, #tpu.memory_space<vmem>>, vector<1x128x128xbf16>
    %10 = vector.shape_cast %9 : vector<1x128x128xbf16> to vector<128x128xbf16>
    %11 = vector.shape_cast %8 : vector<128x128xbf16> to vector<1x128x128xbf16>
    tpu.vector_store %arg5[%c0_7, %c0_8, %c0_9], %11 {strides = array<i32>} : memref<1x128x128xbf16, #tpu.memory_space<vmem>>, vector<1x128x128xbf16>,
    return
  }
  func.func @transform_0(%arg0: i32, %arg1: i32) -> (i32, i32, i32) {
    %c0_i32 = arith.constant 0 : i32
    %c0_i32_0 = arith.constant 0 : i32
    return %arg0, %arg1, %c0_i32 : i32, i32, i32
  }
  func.func @transform_1(%arg0: i32, %arg1: i32) -> (i32, i32) {
    %c0_i32 = arith.constant 0 : i32
    %c0_i32_0 = arith.constant 0 : i32
    %c0_i32_1 = arith.constant 0 : i32
    return %c0_i32, %c0_i32_0 : i32, i32
  }
  func.func @transform_2(%arg0: i32, %arg1: i32) -> (i32, i32) {
    %c0_i32 = arith.constant 0 : i32
    %c0_i32_0 = arith.constant 0 : i32
    %c0_i32_1 = arith.constant 0 : i32
    return %c0_i32, %c0_i32_0 : i32, i32
  }
  func.func @transform_3(%arg0: i32, %arg1: i32) -> (i32, i32, i32) {
    %c0_i32 = arith.constant 0 : i32
    %c0_i32_0 = arith.constant 0 : i32
    return %arg0, %arg1, %c0_i32 : i32, i32, i32
  }
}

</mosaic_0001>

<bundles_post_ra>
// kernel: tpu_custom_call.1
= control target key start
LH: loop header
LB: loop body
LE: loop exit
PB: predicated region body
PF: predicated region fallthrough
CT: control target
= control target key end

     0   :  { %8 = vsyncpa [#allocation3], 0  ;;  %s1850_s0 = inlined_call_operand.hbm [shape: bf16[2,512,256], index: 0, kind: input, shape index: {}]   ;;  %s1851_s1 = inlined_call_operand.vmem [shape: bf16[256,32], index: 1, kind: input, shape index: {}]   ;;  %s1852_s2 = inlined_call_operand.vmem [shape: bf16[32,96], index: 2, kind: input, shape index: {}]   ;;  %s1853_s3 = inlined_call_operand.hbm [shape: bf16[2,512,128], index: 3, kind: output, shape index: {}]  }
   0x1   :  { %10 = vsyncpa [#allocation3 + $0x1], 0 }
   0x2   :  { %11 = vsyncpa [#allocation4], 0 }
   0x3   :  { %13 = vsyncpa [#allocation4 + $0x1], 0  ;;  %s1512_s12 = smov 0   ;;  %s1514_s13 = smov 0  }
   0x4   :  { %s1516_s14 = smov 0   ;;  %s1518_s15 = smov 0  }
   0x5   :  { %s1520_s16 = smov 0   ;;  %s1522_s17 = smov 0  }
   0x6   :  { %s1524_s18 = smov 0   ;;  %s1526_s19 = smov 0  }
   0x7 LB: > { %s944_s20 = sadd.s32 4294967295, %s1483_s19   ;;  %s945_s21 = sadd.s32 4294967294, %s1483_s19   ;;  %s1483_s19 = sphi %s1526_s19, %s19_s19   ;;  %s1479_s18 = sphi %s1524_s18, %s1871_s18   ;;  %s1475_s17 = sphi %s1522_s17, %s1870_s17   ;;  %s1471_s16 = sphi %s1520_s16, %s1869_s16   ;;  %s1467_s15 = sphi %s1518_s15, %s1868_s15   ;;  %s1463_s14 = sphi %s1516_s14, %s1867_s14   ;;  %s1459_s13 = sphi %s1514_s13, %s1866_s13   ;;  %s1455_s12 = sphi %s1512_s12, %s1865_s12  }
   0x8   : > { %s28_s22 = sadd.s32 1, %s1475_s17  ;;  %s31_s23 = sadd.s32 1, %s1479_s18 }
   0x9   : > { %p29_p0 = scmp.ge.s32.totalorder %s28_s22, 4  ;;  %s40_s24 = sadd.s32 1, %s1463_s14 }
   0xa   : > { %p47_p1 = scmp.ne.s32.totalorder %s1463_s14, %s1459_s13  ;;  %p48_p2 = scmp.eq.s32.totalorder %s1483_s19, 0 }
   0xb   : > { %s1873_s22 = smov (%p29_p0, %s28_s22), 0  ;;  %s1875_s23 = smov (!%p29_p0, %s31_s23), %s1479_s18 }
   0xc   : > { %1856 = sst [smem:[#allocation8_spill]] %s1873_s22  ;;  %s36_s25 = ssub.s32 %s1475_s17, %s1873_s22 }
   0xd   : > { %p1565_p3 = por %p48_p2, %p47_p1  ;;  %p33_p4 = scmp.ge.s32.totalorder %s1875_s23, 2 }
   0xe   : > { %p53_p5 = scmp.ne.s32.totalorder %s1459_s13, %s1455_s12  ;;  %p54_p6 = scmp.eq.s32.totalorder %s944_s20, 0 }
   0xf   : > { %p121_p7 = scmp.eq.s32.totalorder %s944_s20, 7  ;;  %s1877_s23 = smov (%p33_p4, %s1875_s23), 0 }
  0x10   : > { %1858 = sst [smem:[#allocation9_spill]] %s1877_s23  ;;  %p1573_p8 = por %p54_p6, %p53_p5 }
  0x11   : > { %p1577_p9 = por %p121_p7, %p47_p1  ;;  %s35_s29 = ssub.s32 %s1479_s18, %s1877_s23 }
  0x12   : > { %p127_p10 = scmp.eq.s32.totalorder %s945_s21, 7  ;;  %s37_s30 = sor.u32 %s36_s25, %s35_s29 }
  0x13   : > { %p38_p11 = scmp.eq.s32.totalorder %s37_s30, 0  ;;  %p1206_p13 = scmp.lt.s32.totalorder %s1483_s19, 8 }
  0x14   : > { %p1583_p12 = por %p127_p10, %p53_p5  ;;  %s153_s5 = sand.u32 1, %s1463_s14  }
  0x15   : > { %s1590_s6 = scalar_select %p38_p11, %s1463_s14, %s40_s24  }
  0x16   : > { %s948_s7 = sshll.u32 %s153_s5, 7  ;;  %s1020_s8 = sshll.u32 %s1475_s17, 5 }
  0x17   : > { %s951_s9 = sshll.u32 %s1479_s18, 7  ;;  %s157_s10 = scalar_lea.vmem [#allocation2], %s948_s7 }
  0x18   : > { %s167_s11 = sshll.u32 %s157_s10, 4  ;;  %s164_s20 = sadd.s32 %s1020_s8, %s951_s9  ;;  %s168_s11 = int_to_ptr.vmem [resolvable:$true] %s167_s11 }
  0x19   : > { %s952_s23 = sshll.u32 %s164_s20, 6  ;;  %p1596_p0 = pnand %p1206_p13, %p1565_p3 }
  0x1a   : > { %s166_s30 = scalar_lea.hbm %s1850_s0, %s952_s23  ;;  %s154_s24 = scalar_lea.sflag [#allocation3], %s153_s5 }
  0x1b   : > { %p1361_p1 = pneg %p1596_p0  ;;  %s1372_s22 = scalar_lea.vmem %s168_s11, 2048 }
  0x1c   : > { %p1373_p2 = scmp.ne.s32.totalorder %s168_s11, %s1372_s22  ;;  %s1485_s7 = smov [#allocation2]  }
  0x1d   : > { %s1377_s8 = sshll.u32 %s1485_s7, 4  ;;  %s1378_s8 = int_to_ptr.vmem [resolvable:$false] %s1377_s8 }
  0x1e   : > { %p1375_p4 = pnand %p1373_p2, %p1361_p1  ;;  %s1379_s26 = scalar_lea.vmem %s1378_s8, 4096 }
  0x1f   : > { %p1380_p3 = scmp.lt.s32.totalorder %s168_s11, %s1378_s8  ;;  %p1381_p6 = scmp.lt.s32.totalorder %s1379_s26, %s1372_s22 }
  0x20   : > { %p1376_p5 = pneg %p1375_p4 }
  0x21   : > { %p1382_p7 = por %p1381_p6, %p1380_p3 }
  0x23   : > { %p1383_p10 = pnand %p1382_p7, %p1376_p5 }
  0x25   : > { %1386 = shalt.err (!%p1383_p10)
}
  0x26   : > { %s1486_s9 = smov 128   ;;  %s1487_s23 = smov 8  }
  0x27   : > { %1201 = dma.hbm_to_vmem [thread:$0]  (!%p1596_p0), %s166_s30, 2048, %s168_s11, %s154_s24, %s1486_s9, %s1486_s9, %s1487_s23  }
  0x28   : > { %p953_p11 = scmp.ge.s32.totalorder %s1483_s19, 1  ;;  %p175_p13 = scmp.lt.s32.totalorder %s1483_s19, 9 }
  0x2a   : > { %p176_p1 = pnand %p953_p11, %p175_p13 }
  0x2b   : > { %s1610_s5 = sand.u32 (!%p176_p1), 1, %s1459_s13  }
  0x2c   : > { %179 = sbr.rel (%p176_p1) target bundleno = 669 (0x29d), region = 32  ;;  %s954_s22 = sshll.u32 (!%p176_p1), %s1610_s5, 7 }
  0x2d   : > { %s182_s10 = scalar_lea.sflag (!%p176_p1), [#allocation3], %s1610_s5  ;;  %s1614_s20 = scalar_lea.vmem (!%p176_p1), [#allocation2], %s954_s22 }
  0x31   : > { %1446 = dma.done.wait (%p1573_p8), %s182_s10, 2048  }
  0x32   : > { %1448 = vsyncadd (%p1573_p8), %s182_s10, 4294965248  ;;  %v1317_v0 = vld [vmem:[%s1851_s1 + $0x78] sm:$0xff]   ;;  %v1319_v2 = vld [vmem:[%s1851_s1 + $0x70] sm:$0xff]   ;;  %vm556_vm0 = vcmask 261120   ;;  %s955_s27 = sshll.u32 %s1610_s5, 6  ;;  %s1015_s9 = sshll.u32 %s1467_s15, 4 }
  0x33   : > { %v1318_v1 = vld [vmem:[%s1851_s1 + $0x38] sm:$0xff]   ;;  %1084 = vmatprep.subr.bf16.mxu0 %v1317_v0  ;;  %1178 = vmatprep.subr.bf16.mxu1 %v1317_v0  ;;  %v1320_v3 = vld [vmem:[%s1851_s1 + $0x30] sm:$0xff]   ;;  %v1321_v4 = vld [vmem:[%s1851_s1 + $0x68] sm:$0xff]   ;;  %s1751_s26 = scalar_lea.vmem [#allocation5], %s955_s27  ;;  %s1016_s23 = sshll.u32 %s1471_s16, 6 }
  0x34   : > { %1085 = vmatpush3.bf16.msra.mxu0 %v1318_v1  ;;  %1186 = vmatpush3.bf16.msra.mxu1 %v1318_v1  ;;  %v1322_v5 = vld [vmem:[%s1851_s1 + $0x28] sm:$0xff]   ;;  %v1323_v6 = vld [vmem:[%s1851_s1 + $0x60] sm:$0xff]   ;;  %v1325_v8 = vld [vmem:[%s1851_s1 + $0x58] sm:$0xff]   ;;  %s851_s22 = sadd.s32 %s1016_s23, %s1015_s9  ;;  %s854_s15 = sshll.u32 %s1751_s26, 4  ;;  %s1795_s15 = int_to_ptr.vmem [resolvable:$true] %s854_s15 }
  0x35   : > { %1086 = vmatprep.subr.bf16.mxu0 %v1319_v2  ;;  %1179 = vmatprep.subr.bf16.mxu1 %v1319_v2  ;;  %v1324_v7 = vld [vmem:[%s1851_s1 + $0x20] sm:$0xff]   ;;  %v1326_v9 = vld [vmem:[%s1851_s1 + $0x18] sm:$0xff]   ;;  %v1327_v10 = vld [vmem:[%s1851_s1 + $0x50] sm:$0xff]   ;;  %s1017_s10 = sshll.u32 %s851_s22, 6  ;;  %s839_s25 = scalar_lea.sflag [#allocation4], %s1610_s5 }
  0x36   : > { %v1335_v11 = vld [vmem:[%s1614_s20 + $0x4] ss:$8 sps:$4 sm:$0xff]   ;;  %v1328_v12 = vld [vmem:[%s1851_s1 + $0x10] sm:$0xff]   ;;  %v1333_v18 = vld [vmem:[%s1614_s20] ss:$8 sps:$4 sm:$0xff]   ;;  %s1793_s21 = scalar_lea.hbm %s1853_s3, %s1017_s10  ;;  %s1387_s29 = scalar_lea.vmem %s1795_s15, 1024 }
  0x37   : > { %467 = vmatprep.mubr.bf16.mxu0 %v1335_v11  ;;  %v1329_v13 = vld [vmem:[%s1851_s1 + $0x48] sm:$0xff]   ;;  %v1331_v16 = vld [vmem:[%s1851_s1 + $0x40] sm:$0xff]   ;;  %v1336_v19 = vld [vmem:[%s1614_s20 + $0x14] ss:$8 sps:$4 sm:$0xff]   ;;  %p1388_p8 = scmp.ne.s32.totalorder %s1795_s15, %s1387_s29  ;;  %s1489_s30 = smov [#allocation5]  }
  0x38   : > { %1087 = vmatpush3.bf16.msra.mxu0 %v1320_v3  ;;  %1187 = vmatpush3.bf16.msra.mxu1 %v1320_v3  ;;  %v1330_v14 = vld [vmem:[%s1851_s1 + $0x8] sm:$0xff]   ;;  %v1332_v17 = vld [vmem:[%s1851_s1] sm:$0xff]   ;;  %v1354_v21 = vld [vmem:[%s1614_s20 + $0x74] ss:$8 sps:$4 sm:$0xff]   ;;  %s1391_s24 = sshll.u32 %s1489_s30, 4  ;;  %s1392_s24 = int_to_ptr.vmem [resolvable:$false] %s1391_s24 }
  0x39   : > { %1088 = vmatprep.subr.bf16.mxu0 %v1321_v4  ;;  %1180 = vmatprep.subr.bf16.mxu1 %v1321_v4  ;;  %v1350_v15 = vld [vmem:[%s1614_s20 + $0x64] ss:$8 sps:$4 sm:$0xff]   ;;  %v1348_v20 = vld [vmem:[%s1614_s20 + $0x60] ss:$8 sps:$4 sm:$0xff]   ;;  %v1338_v22 = vld [vmem:[%s1614_s20 + $0x10] ss:$8 sps:$4 sm:$0xff]   ;;  %p1389_p0 = pnand %p1388_p8, %p1577_p9  ;;  %p1394_p4 = scmp.lt.s32.totalorder %s1795_s15, %s1392_s24 }
  0x3a   : > { %515 = vmatprep.mubr.bf16.mxu1 %v1350_v15  ;;  %v1339_v23 = vld [vmem:[%s1614_s20 + $0x24] ss:$8 sps:$4 sm:$0xff]   ;;  %v1356_v24 = vld [vmem:[%s1614_s20 + $0x70] ss:$8 sps:$4 sm:$0xff]   ;;  %v1341_v25 = vld [vmem:[%s1614_s20 + $0x20] ss:$8 sps:$4 sm:$0xff]  }
  0x3b   : > { %v1342_v26 = vld [vmem:[%s1614_s20 + $0x34] ss:$8 sps:$4 sm:$0xff]   ;;  %v1344_v27 = vld [vmem:[%s1614_s20 + $0x30] ss:$8 sps:$4 sm:$0xff]   ;;  %v1345_v28 = vld [vmem:[%s1614_s20 + $0x44] ss:$8 sps:$4 sm:$0xff]   ;;  %p1390_p2 = pneg %p1389_p0 }
  0x3c   : > { %1089 = vmatpush3.bf16.msra.mxu0 %v1322_v5  ;;  %1188 = vmatpush3.bf16.msra.mxu1 %v1322_v5  ;;  %v1347_v29 = vld [vmem:[%s1614_s20 + $0x40] ss:$8 sps:$4 sm:$0xff]   ;;  %v1351_v30 = vld [vmem:[%s1614_s20 + $0x54] ss:$8 sps:$4 sm:$0xff]   ;;  %v1353_v31 = vld [vmem:[%s1614_s20 + $0x50] ss:$8 sps:$4 sm:$0xff]  }
  0x3d   : > { %1090 = vmatprep.subr.bf16.mxu0 %v1323_v6  ;;  %1181 = vmatprep.subr.bf16.mxu1 %v1323_v6  ;;  %v1357_v32 = vld [vmem:[%s1852_s2 + $0x8] sm:$0xff]   ;;  %v1358_v33 = vld [vmem:[%s1852_s2] sm:$0xff]   ;;  %s1488_s20 = smov 32   ;;  %s1393_s7 = scalar_lea.vmem %s1392_s24, 2048 }
  0x3e   : > { %p1395_p5 = scmp.lt.s32.totalorder %s1393_s7, %s1387_s29 }
  0x40   : > { %1091 = vmatpush3.bf16.msra.mxu0 %v1324_v7  ;;  %1189 = vmatpush3.bf16.msra.mxu1 %v1324_v7  ;;  %p1396_p3 = por %p1395_p5, %p1394_p4 }
  0x41   : > { %1092 = vmatprep.subr.bf16.mxu0 %v1325_v8  ;;  %1182 = vmatprep.subr.bf16.mxu1 %v1325_v8 }
  0x42   : > { %p1397_p6 = pnand %p1396_p3, %p1390_p2 }
  0x44   : > { %1093 = vmatpush3.bf16.msra.mxu0 %v1326_v9  ;;  %1190 = vmatpush3.bf16.msra.mxu1 %v1326_v9 }
  0x45   : > { %1094 = vmatprep.subr.bf16.mxu0 %v1327_v10  ;;  %1183 = vmatprep.subr.bf16.mxu1 %v1327_v10 }
  0x48   : > { %1095 = vmatpush3.bf16.msra.mxu0 %v1328_v12  ;;  %1191 = vmatpush3.bf16.msra.mxu1 %v1328_v12 }
  0x49   : > { %1096 = vmatprep.subr.bf16.mxu0 %v1329_v13  ;;  %1184 = vmatprep.subr.bf16.mxu1 %v1329_v13 }
  0x4c   : > { %1097 = vmatpush3.bf16.msra.mxu0 %v1330_v14  ;;  %1192 = vmatpush3.bf16.msra.mxu1 %v1330_v14 }
  0x4d   : > { %1098 = vmatprep.subr.bf16.mxu0 %v1331_v16  ;;  %1185 = vmatprep.subr.bf16.mxu1 %v1331_v16 }
  0x50   : > { %1099 = vmatpush3.bf16.msra.mxu0 %v1332_v17  ;;  %1193 = vmatpush3.bf16.msra.mxu1 %v1332_v17 }
  0x51   : > { %1158 = vmatprep.subr.bf16.mxu1 %v1357_v32 }
  0x53   : > { %468 = vmatmul.mubr.bf16.vlgmr.msra.gmra.mxu0 %v1333_v18  ;;  %516 = vmatmul.mubr.bf16.vlgmr.msra.gmra.mxu1 %v1348_v20 }
  0x54   : > { %475 = vmatprep.mubr.bf16.mxu0 %v1336_v19  ;;  %523 = vmatprep.mubr.bf16.mxu1 %v1354_v21 }
  0x55   : > { %1159 = vmatpush3.bf16.msra.mxu1 %v1357_v32 }
  0x56   : > { %1160 = vmatprep.subr.bf16.mxu1 %v1358_v33 }
  0x59   : > { %1161 = vmatpush3.bf16.msra.mxu1 %v1358_v33 }
  0x5b   : > { %476 = vmatmul.mubr.bf16.gmra.mxu0 %v1338_v22  ;;  %524 = vmatmul.mubr.bf16.gmra.mxu1 %v1356_v24 }
  0x5c   : > { %483 = vmatprep.mubr.bf16.mxu0 %v1339_v23 }
  0x63   : > { %484 = vmatmul.mubr.bf16.gmra.mxu0 %v1341_v25 }
  0x64   : > { %491 = vmatprep.mubr.bf16.mxu0 %v1342_v26 }
  0x6b   : > { %492 = vmatmul.mubr.bf16.gmra.mxu0 %v1344_v27 }
  0x6c   : > { %499 = vmatprep.mubr.bf16.mxu0 %v1345_v28 }
  0x73   : > { %500 = vmatmul.mubr.bf16.gmra.mxu0 %v1347_v29 }
  0x74   : > { %507 = vmatprep.mubr.bf16.mxu0 %v1351_v30 }
  0x7b   : > { %508 = vmatmul.mubr.bf16.gmra.mxu0 %v1353_v31 }
 0x113   : > { %v1100_v34 = vpop.f32.mrf.mxu0  ;;  %v1136_v52 = vpop.f32.mrf.mxu1 }
 0x115   : > { %v1101_v35 = vpop.f32.mrf.mxu0  ;;  %v1137_v58 = vpop.f32.mrf.mxu1 }
 0x116   : > { %v1690_v38 = vadd.f32 %v1101_v35, %v1100_v34  ;;  %v1725_v14 = vadd.f32 %v1137_v58, %v1136_v52 }
 0x117   : > { %v1103_v36 = vpop.f32.mrf.mxu0  ;;  %v1139_v61 = vpop.f32.mrf.mxu1 }
 0x119   : > { %v1104_v37 = vpop.f32.mrf.mxu0  ;;  %v1140_v3 = vpop.f32.mrf.mxu1 }
 0x11a   : > { %v1692_v39 = vadd.f32 %v1104_v37, %v1103_v36  ;;  %v1727_v15 = vadd.f32 %v1140_v3, %v1139_v61 }
 0x11b   : > { %v1106_v40 = vpop.f32.mrf.mxu0  ;;  %v1142_v6 = vpop.f32.mrf.mxu1 }
 0x11c   : > { %v532_v41 = vpack.c.bf16 %v1692_v39, %v1690_v38  ;;  %v538_v21 = vpack.c.bf16 %v1727_v15, %v1725_v14 }
 0x11d   : > { %v1107_v42 = vpop.f32.mrf.mxu0  ;;  %v1143_v12 = vpop.f32.mrf.mxu1 }
 0x11e   : > { %1162 = vmatprep.mubr.msk.bf16.mxu1 %vm556_vm0, %v532_v41  ;;  %v1697_v45 = vadd.f32 %v1107_v42, %v1106_v40  ;;  %v1739_v23 = vadd.f32 %v1143_v12, %v1142_v6 }
 0x11f   : > { %v1109_v43 = vpop.f32.mrf.mxu0  ;;  %v1145_v17 = vpop.f32.mrf.mxu1 }
 0x121   : > { %v1110_v44 = vpop.f32.mrf.mxu0  ;;  %v1146_v22 = vpop.f32.mrf.mxu1 }
 0x122   : > { %v1699_v46 = vadd.f32 %v1110_v44, %v1109_v43  ;;  %v1741_v24 = vadd.f32 %v1146_v22, %v1145_v17 }
 0x123   : > { %v1112_v47 = vpop.f32.mrf.mxu0 }
 0x124   : > { %v533_v48 = vpack.c.bf16 %v1699_v46, %v1697_v45  ;;  %v539_v25 = vpack.c.bf16 %v1741_v24, %v1739_v23 }
 0x125   : > { %v1113_v49 = vpop.f32.mrf.mxu0 }
 0x126   : > { %1163 = vmatmul.mubr.msk.bf16.vlgmr.msra.gmra.mxu1 %vm556_vm0, %v533_v48  ;;  %v1704_v53 = vadd.f32 %v1113_v49, %v1112_v47 }
 0x127   : > { %v1115_v50 = vpop.f32.mrf.mxu0 }
 0x129   : > { %v1116_v51 = vpop.f32.mrf.mxu0 }
 0x12a   : > { %v1706_v54 = vadd.f32 %v1116_v51, %v1115_v50 }
 0x12b   : > { %v1118_v55 = vpop.f32.mrf.mxu0 }
 0x12c   : > { %v534_v56 = vpack.c.bf16 %v1706_v54, %v1704_v53 }
 0x12d   : > { %v1119_v57 = vpop.f32.mrf.mxu0 }
 0x12e   : > { %1166 = vmatprep.mubr.msk.bf16.mxu1 %vm556_vm0, %v534_v56  ;;  %v1711_v62 = vadd.f32 %v1119_v57, %v1118_v55 }
 0x12f   : > { %v1121_v59 = vpop.f32.mrf.mxu0 }
 0x131   : > { %v1122_v60 = vpop.f32.mrf.mxu0 }
 0x132   : > { %v1713_v63 = vadd.f32 %v1122_v60, %v1121_v59 }
 0x133   : > { %v1124_v0 = vpop.f32.mrf.mxu0 }
 0x134   : > { %v535_v1 = vpack.c.bf16 %v1713_v63, %v1711_v62 }
 0x135   : > { %v1125_v2 = vpop.f32.mrf.mxu0 }
 0x136   : > { %1167 = vmatmul.mubr.msk.bf16.gmra.mxu1 %vm556_vm0, %v535_v1  ;;  %v1718_v7 = vadd.f32 %v1125_v2, %v1124_v0 }
 0x137   : > { %v1127_v4 = vpop.f32.mrf.mxu0 }
 0x139   : > { %v1128_v5 = vpop.f32.mrf.mxu0 }
 0x13a   : > { %v1720_v8 = vadd.f32 %v1128_v5, %v1127_v4 }
 0x13b   : > { %v1130_v9 = vpop.f32.mrf.mxu0 }
 0x13c   : > { %v536_v10 = vpack.c.bf16 %v1720_v8, %v1718_v7 }
 0x13d   : > { %v1131_v11 = vpop.f32.mrf.mxu0 }
 0x13e   : > { %1170 = vmatprep.mubr.msk.bf16.mxu1 %vm556_vm0, %v536_v10  ;;  %v1729_v18 = vadd.f32 %v1131_v11, %v1130_v9 }
 0x13f   : > { %v1133_v13 = vpop.f32.mrf.mxu0 }
 0x141   : > { %v1134_v16 = vpop.f32.mrf.mxu0 }
 0x142   : > { %v1731_v19 = vadd.f32 %v1134_v16, %v1133_v13 }
 0x144   : > { %v537_v20 = vpack.c.bf16 %v1731_v19, %v1729_v18 }
 0x146   : > { %1171 = vmatmul.mubr.msk.bf16.gmra.mxu1 %vm556_vm0, %v537_v20 }
 0x147   : > { %1174 = vmatprep.mubr.msk.bf16.mxu1 %vm556_vm0, %v538_v21 }
 0x14e   : > { %1175 = vmatmul.mubr.msk.bf16.gmra.mxu1 %vm556_vm0, %v539_v25 }
 0x1e6   : > { %v1164_v26 = vpop.f32.mrf.mxu1 }
 0x1e8   : > { %v615_v27 = vpop.f32.mrf.mxu1 }
 0x1ea   : > { %v1165_v28 = vpop.f32.mrf.mxu1 }
 0x1eb   : > { %v1277_v29 = vpack.i.bf16 %v1165_v28, %v1164_v26 }
 0x1ec   : > { %v618_v30 = vpop.f32.mrf.mxu1 }
 0x1ed   : > { %1278 = vrot.lane.b32.xlu0 %v1277_v29, %s1488_s20  ;;  %v1282_v31 = vpack.i.bf16 %v618_v30, %v615_v27 }
 0x1f1   : > { %1283 = vrot.lane.b32.xlu0 %v1282_v31, %s1488_s20 }
 0x1f6   : > { %v1168_v32 = vpop.f32.mrf.mxu1 }
 0x1f8   : > { %v631_v33 = vpop.f32.mrf.mxu1 }
 0x1fa   : > { %v1169_v34 = vpop.f32.mrf.mxu1 }
 0x1fb   : > { %v1287_v35 = vpack.i.bf16 %v1169_v34, %v1168_v32 }
 0x1fc   : > { %v634_v36 = vpop.f32.mrf.mxu1 }
 0x1fd   : > { %1288 = vrot.lane.b32.xlu1 %v1287_v35, %s1488_s20  ;;  %v1292_v37 = vpack.i.bf16 %v634_v36, %v631_v33 }
 0x201   : > { %1293 = vrot.lane.b32.xlu1 %v1292_v37, %s1488_s20 }
 0x206   : > { %v1172_v40 = vpop.f32.mrf.mxu1 }
 0x208   : > { %v647_v41 = vpop.f32.mrf.mxu1 }
 0x20a   : > { %v1173_v42 = vpop.f32.mrf.mxu1 }
 0x20b   : > { %v1297_v43 = vpack.i.bf16 %v1173_v42, %v1172_v40 }
 0x20c   : > { %v650_v44 = vpop.f32.mrf.mxu1 }
 0x20d   : > { %v1302_v47 = vpack.i.bf16 %v650_v44, %v647_v41  ;;  %1298 = vrot.lane.b32.xlu1 %v1297_v43, %s1488_s20 }
 0x20e   : > { %v1176_v48 = vpop.f32.mrf.mxu1 }
 0x20f   : > { %1303 = vrot.lane.b32.xlu0 %v1302_v47, %s1488_s20 }
 0x210   : > { %v663_v49 = vpop.f32.mrf.mxu1 }
 0x212   : > { %v1177_v50 = vpop.f32.mrf.mxu1 }
 0x213   : > { %v1312_v51 = vpack.i.bf16 %v1177_v50, %v1176_v48 }
 0x214   : > { %v666_v52 = vpop.f32.mrf.mxu1 }
 0x215   : > { %v1307_v55 = vpack.i.bf16 %v666_v52, %v663_v49  ;;  %1313 = vrot.lane.b32.xlu1 %v1312_v51, %s1488_s20 }
 0x217   : > { %1308 = vrot.lane.b32.xlu0 %v1307_v55, %s1488_s20 }
 0x25f   : > { %v1279_v56 = vpop.permute.xlu0 %1278 }
 0x260   : > { %v1281_v57 = vunpack.i.h.bf16 %v1279_v56  ;;  %v1280_v58 = vunpack.i.l.bf16 %v1279_v56 }
 0x262   : > { %v745_v59 = vsel %vm556_vm0, %v1699_v46, %v1281_v57  ;;  %v744_v60 = vsel %vm556_vm0, %v1697_v45, %v1280_v58 }
 0x263   : > { %v1045_v61 = vpack.c.bf16 %v745_v59, %v744_v60  ;;  %v1284_v0 = vpop.permute.xlu0 %1283 }
 0x264   : > { %v1286_v1 = vunpack.i.h.bf16 %v1284_v0  ;;  %v1285_v2 = vunpack.i.l.bf16 %v1284_v0 }
 0x265   : > { %1077 = vst [vmem:[%s1751_s26 + $0x8] sm:$0xff] %v1045_v61  }
 0x266   : > { %v743_v3 = vsel %vm556_vm0, %v1692_v39, %v1286_v1  ;;  %v742_v4 = vsel %vm556_vm0, %v1690_v38, %v1285_v2 }
 0x267   : > { %v1040_v46 = vpack.c.bf16 %v743_v3, %v742_v4 }
 0x269   : > { %1041 = vst [vmem:[%s1751_s26] sm:$0xff] %v1040_v46  }
 0x26f   : > { %v1289_v45 = vpop.permute.xlu1 %1288 }
 0x270   : > { %v1291_v5 = vunpack.i.h.bf16 %v1289_v45  ;;  %v1290_v6 = vunpack.i.l.bf16 %v1289_v45 }
 0x272   : > { %v749_v9 = vsel %vm556_vm0, %v1713_v63, %v1291_v5  ;;  %v748_v10 = vsel %vm556_vm0, %v1711_v62, %v1290_v6 }
 0x273   : > { %v1055_v11 = vpack.c.bf16 %v749_v9, %v748_v10  ;;  %v1294_v12 = vpop.permute.xlu1 %1293 }
 0x274   : > { %v1296_v13 = vunpack.i.h.bf16 %v1294_v12  ;;  %v1295_v39 = vunpack.i.l.bf16 %v1294_v12 }
 0x275   : > { %1079 = vst [vmem:[%s1751_s26 + $0x18] sm:$0xff] %v1055_v11  }
 0x276   : > { %v747_v38 = vsel %vm556_vm0, %v1706_v54, %v1296_v13  ;;  %v746_v16 = vsel %vm556_vm0, %v1704_v53, %v1295_v39 }
 0x277   : > { %v1050_v17 = vpack.c.bf16 %v747_v38, %v746_v16 }
 0x279   : > { %1078 = vst [vmem:[%s1751_s26 + $0x10] sm:$0xff] %v1050_v17  }
 0x27f   : > { %v1299_v63 = vpop.permute.xlu1 %1298 }
 0x280   : > { %v1301_v20 = vunpack.i.h.bf16 %v1299_v63  ;;  %v1300_v62 = vunpack.i.l.bf16 %v1299_v63 }
 0x281   : > { %v1304_v21 = vpop.permute.xlu0 %1303 }
 0x282   : > { %v753_v22 = vsel %vm556_vm0, %v1731_v19, %v1301_v20  ;;  %v752_v25 = vsel %vm556_vm0, %v1729_v18, %v1300_v62  ;;  %v1306_v26 = vunpack.i.h.bf16 %v1304_v21  ;;  %v1305_v54 = vunpack.i.l.bf16 %v1304_v21 }
 0x283   : > { %v1065_v27 = vpack.c.bf16 %v753_v22, %v752_v25 }
 0x284   : > { %v751_v53 = vsel %vm556_vm0, %v1720_v8, %v1306_v26  ;;  %v750_v28 = vsel %vm556_vm0, %v1718_v7, %v1305_v54 }
 0x285   : > { %1081 = vst [vmem:[%s1751_s26 + $0x28] sm:$0xff] %v1065_v27   ;;  %v1060_v29 = vpack.c.bf16 %v751_v53, %v750_v28 }
 0x287   : > { %1080 = vst [vmem:[%s1751_s26 + $0x20] sm:$0xff] %v1060_v29   ;;  %v1314_v19 = vpop.permute.xlu1 %1313 }
 0x288   : > { %v1316_v30 = vunpack.i.h.bf16 %v1314_v19  ;;  %v1315_v18 = vunpack.i.l.bf16 %v1314_v19 }
 0x289   : > { %v1309_v31 = vpop.permute.xlu0 %1308 }
 0x28a   : > { %v757_v8 = vsel %vm556_vm0, %v1741_v24, %v1316_v30  ;;  %v756_v7 = vsel %vm556_vm0, %v1739_v23, %v1315_v18  ;;  %v1311_v32 = vunpack.i.h.bf16 %v1309_v31  ;;  %v1310_v33 = vunpack.i.l.bf16 %v1309_v31 }
 0x28b   : > { %v1075_v34 = vpack.c.bf16 %v757_v8, %v756_v7 }
 0x28c   : > { %v755_v35 = vsel %vm556_vm0, %v1727_v15, %v1311_v32  ;;  %v754_v36 = vsel %vm556_vm0, %v1725_v14, %v1310_v33 }
 0x28d   : > { %1083 = vst [vmem:[%s1751_s26 + $0x38] sm:$0xff] %v1075_v34   ;;  %v1070_v23 = vpack.c.bf16 %v755_v35, %v754_v36 }
 0x28f   : > { %1082 = vst [vmem:[%s1751_s26 + $0x30] sm:$0xff] %v1070_v23  }
 0x290   : > { %1400 = shalt.err (!%p1397_p6)
}
 0x291   : > { %s1401_s8 = scalar_lea.hbm %s1793_s21, 1024  ;;  %s1405_s26 = scalar_lea.hbm %s1853_s3, 8192 }
 0x292   : > { %p1402_p7 = scmp.ne.s32.totalorder %s1793_s21, %s1401_s8  ;;  %p1406_p13 = scmp.lt.s32.totalorder %s1793_s21, %s1853_s3 }
 0x293   : > { %p1407_p1 = scmp.lt.s32.totalorder %s1405_s26, %s1401_s8 }
 0x294   : > { %p1403_p10 = pnand %p1402_p7, %p1577_p9 }
 0x295   : > { %p1408_p8 = por %p1407_p1, %p1406_p13 }
 0x296   : > { %p1404_p11 = pneg %p1403_p10 }
 0x298   : > { %p1409_p0 = pnand %p1408_p8, %p1404_p11 }
 0x29a   : > { %1412 = shalt.err (!%p1409_p0)
}
 0x29b   : > { %s1490_s22 = smov 64   ;;  %s1491_s10 = smov 4  }
 0x29c   : > { %1196 = dma.vmem_to_hbm [thread:$0]  (%p1577_p9), %s1795_s15, 1024, %s1793_s21, %s839_s25, %s1490_s22, %s1490_s22, %s1491_s10  }
 0x29d PF: > { %p1207_p2 = scmp.ge.s32.totalorder %s1483_s19, 2  ;;  %s869_s16 = sand.u32 1, %s1455_s12  }
 0x29e   : > { %s870_s11 = scalar_lea.sflag [#allocation4], %s869_s16 }
 0x29f   : > { %p1203_p4 = pnand %p1207_p2, %p1583_p12 }
 0x2a1   : > { %p1204_p5 = pneg %p1203_p4 }
 0x2a3   : > { %1450 = dma.done.wait (%p1204_p5), %s870_s11, 1024  }
 0x2a4   : > { %1452 = vsyncadd (%p1204_p5), %s870_s11, 4294966272  ;;  %s19_s19 = sadd.s32 1, %s1483_s19   ;;  %s1863_s28 = sld [smem:[#allocation8_spill]] }
 0x2a5   : > { %p16_p3 = scmp.ge.s32.totalorder %s19_s19, 10   ;;  %s1864_s5 = sld [smem:[#allocation9_spill]] }
 0x2a6   : > { %s1865_s12 = smov %s1459_s13  ;;  %s1866_s13 = smov %s1463_s14 }
 0x2a7   : > { %s1867_s14 = smov %s1590_s6  ;;  %s1868_s15 = smov %s1475_s17 }
 0x2a8   : > { %s1869_s16 = smov %s1479_s18  ;;  %18 = sbr.rel (!%p16_p3) target bundleno = 7 (0x7), region = 77 }
 0x2aa   : > { %s1870_s17 = smov %s1863_s28 }
 0x2ab   : > { %s1871_s18 = smov %s1864_s5 }
 0x2ad   :  { %875 = vsyncpa [#allocation3], 1 }
 0x2ae   :  { %877 = vsyncpa [#allocation3 + $0x1], 1 }
 0x2af   :  { %878 = vsyncpa [#allocation4], 1 }
 0x2b0   :  { %880 = vsyncpa [#allocation4 + $0x1], 1 }

</bundles_post_ra>
